<compile_context>
chip_gen: v6e
topology: v6e:2x2x1
jax: 0.10.0
libtpu: 0.0.40
codegen_flags: <defaults>
</compile_context>

<pallas_src>
import jax
import jax.numpy as jnp
from jax.experimental import pallas as pl
from jax.experimental.pallas import tpu as pltpu


def rnn_fc_sigmoid_kernel(x_ref, wih_ref, whh_ref, b_ref, wfc_ref, bfc_ref,
                          out_ref):
    """Single-invocation RNN forward.

    x_ref  : (T*Bp, I)  bf16, time-major flattened input; row = t*Bp + b
    wih_ref: (I, H)     bf16, W_ih^T
    whh_ref: (H, H)     bf16, W_hh^T
    b_ref  : (1, H)     f32,  b_ih + b_hh (pre-summed in the wrapper)
    wfc_ref: (H, O)     bf16, W_fc^T
    bfc_ref: (1, O)     f32,  b_fc
    out_ref: (Bp, O)    f32,  sigmoid(fc(h_T)) on the padded batch
    """
    Bp = out_ref.shape[0]              # padded (sublane-aligned) batch
    T = x_ref.shape[0] // Bp

    # Hoisted loads: one vld burst each, reused across all unrolled steps.
    whh = whh_ref[...]                 # (H, H) bf16, stays in vregs
    b = b_ref[...]                     # (1, H) f32

    # Input projection for ALL timesteps in one MXU matmul (off serial chain).
    xw = (jnp.dot(x_ref[...], wih_ref[...],
                  preferred_element_type=jnp.float32)
          + b)                         # (T*Bp, H) f32

    # Recurrence. h_0 = 0  =>  h_1 = tanh(xw[0]); only cast + h@W_hh^T + add +
    # tanh sit on the serial chain. Fully unrolled, 8-row-aligned static slices.
    h = jnp.tanh(xw[0:Bp, :])
    for t in range(1, T):
        h = jnp.tanh(xw[t * Bp:(t + 1) * Bp, :]
                     + jnp.dot(h.astype(whh.dtype), whh,
                               preferred_element_type=jnp.float32))

    # Epilogue: fc on the (padded) last hidden state, then sigmoid.
    logits = (jnp.dot(h.astype(wfc_ref.dtype), wfc_ref[...],
                      preferred_element_type=jnp.float32)
              + bfc_ref[...])
    out_ref[...] = jax.nn.sigmoid(logits)


def neural_network_forward(x, params):
    """x: (B, T, input_size) float32, batch-first like the PyTorch module."""
    B, T, I = x.shape
    H = params["w_hh_t"].shape[0]
    O = params["w_fc_t"].shape[1]

    # Pad batch to a sublane multiple so every per-step slice in the kernel is
    # 8-row aligned (zero-cost view) and the MXU LHS is a full-sublane tile.
    B_pad = ((B + 7) // 8) * 8
    x_tm = jnp.transpose(x, (1, 0, 2))                     # (T, B, I) time-major
    x_tm = jnp.pad(x_tm, ((0, 0), (0, B_pad - B), (0, 0)))  # (T, Bp, I)
    x2d = x_tm.reshape(T * B_pad, I).astype(jnp.bfloat16)   # bf16 MXU operand

    # bf16 MXU operands; biases / activations stay f32 inside the kernel.
    w_ih = params["w_ih_t"].astype(jnp.bfloat16)
    w_hh = params["w_hh_t"].astype(jnp.bfloat16)
    w_fc = params["w_fc_t"].astype(jnp.bfloat16)

    # v7x VMEM guard: the whole-array-resident design must fit comfortably in
    # the ~32 MiB default-scoped VMEM (v7x has 64 MiB physical). At toy shapes
    # this is a few KiB. TODO(synk): if T/B/H grow past this, tile the time
    # axis with a grid + BlockSpec ('arbitrary') and carry h in VMEM scratch.
    resident_bytes = (x2d.size * 2 + w_ih.size * 2 + w_hh.size * 2
                      + w_fc.size * 2 + params["b"].size * 4
                      + params["b_fc"].size * 4
                      + T * B_pad * H * 4            # xw intermediate (f32)
                      + B_pad * O * 4)               # output
    assert resident_bytes < 16 * 1024 * 1024, "re-tile: exceeds VMEM budget"

    vmem = pl.BlockSpec(memory_space=pltpu.MemorySpace.VMEM)  # whole array in VMEM
    out_pad = pl.pallas_call(
        rnn_fc_sigmoid_kernel,
        out_shape=jax.ShapeDtypeStruct((B_pad, O), jnp.float32),
        in_specs=[vmem] * 6,
        out_specs=vmem,
    )(x2d, w_ih, w_hh, params["b"], w_fc, params["b_fc"])

    # Drop the padded batch rows (they hold sigmoid(fc(tanh-chain of bias))).
    return out_pad[:B]


def init_params(key, input_size, hidden_size, output_size):
    """Deterministic f32 init mimicking PyTorch's U(-1/sqrt(H), 1/sqrt(H))."""
    k = jax.random.split(key, 6)
    bound = 1.0 / jnp.sqrt(hidden_size)

    w_ih = jax.random.uniform(k[0], (hidden_size, input_size), jnp.float32,
                              -bound, bound)
    w_hh = jax.random.uniform(k[1], (hidden_size, hidden_size), jnp.float32,
                              -bound, bound)
    b_ih = jax.random.uniform(k[2], (hidden_size,), jnp.float32, -bound, bound)
    b_hh = jax.random.uniform(k[3], (hidden_size,), jnp.float32, -bound, bound)
    w_fc = jax.random.uniform(k[4], (output_size, hidden_size), jnp.float32,
                              -bound, bound)
    b_fc = jax.random.uniform(k[5], (output_size,), jnp.float32, -bound, bound)

    return {
        "w_ih_t": w_ih.T,                                  # (I, H) f32
        "w_hh_t": w_hh.T,                                  # (H, H) f32
        "b": (b_ih + b_hh).reshape(1, hidden_size),        # (1, H) pre-summed
        "w_fc_t": w_fc.T,                                  # (H, O) f32
        "b_fc": b_fc.reshape(1, output_size),              # (1, O)
    }


def reference_forward(x, params):
    """Pure-JAX f32 reference matching nn.RNN(tanh) + last step + Linear + sigmoid."""
    B, T, I = x.shape
    H = params["w_hh_t"].shape[0]
    h = jnp.zeros((B, H), jnp.float32)
    for t in range(T):
        h = jnp.tanh(x[:, t, :] @ params["w_ih_t"] + h @ params["w_hh_t"]
                     + params["b"])
    return jax.nn.sigmoid(h @ params["w_fc_t"] + params["b_fc"])


if __name__ == "__main__":
    batch, seq_len = 2, 8
    input_size, hidden_size, output_size = 16, 32, 4

    key = jax.random.PRNGKey(0)
    kx, kp = jax.random.split(key)
    x = jax.random.normal(kx, (batch, seq_len, input_size), jnp.float32)
    params = init_params(kp, input_size, hidden_size, output_size)

    out = neural_network_forward(x, params)
    out = jax.block_until_ready(out)

    ref = reference_forward(x, params)
    assert out.shape == (batch, output_size)
    # Tolerance loosened for bf16 MXU operands (f32 accumulation, f32 ref).
    assert jnp.allclose(out, ref, atol=2e-2, rtol=2e-2), \
        "Pallas kernel mismatch vs JAX reference"

    print("KERNEL_OK")
</pallas_src>

<mosaic_0001>
module attributes {stable_mosaic.version = 11 : i64} {
  func.func @rnn_fc_sigmoid_kernel(%arg0: memref<64x16xbf16, #tpu.memory_space<vmem>>, %arg1: memref<16x32xbf16, #tpu.memory_space<vmem>>, %arg2: memref<32x32xbf16, #tpu.memory_space<vmem>>, %arg3: memref<1x32xf32, #tpu.memory_space<vmem>>, %arg4: memref<32x4xbf16, #tpu.memory_space<vmem>>, %arg5: memref<1x4xf32, #tpu.memory_space<vmem>>, %arg6: memref<8x4xf32, #tpu.memory_space<vmem>>) attributes {dimension_semantics = [], scalar_prefetch = 0 : i64, scratch_operands = 0 : i64, tpu.core_type = #tpu.core_type<tc>} {
    %c0 = arith.constant 0 : index
    %c0_0 = arith.constant 0 : index
    %0 = vector.load %arg2[%c0, %c0_0] : memref<32x32xbf16, #tpu.memory_space<vmem>>, vector<32x32xbf16>
    %c0_1 = arith.constant 0 : index
    %c0_2 = arith.constant 0 : index
    %1 = vector.load %arg3[%c0_1, %c0_2] : memref<1x32xf32, #tpu.memory_space<vmem>>, vector<1x32xf32>
    %c0_3 = arith.constant 0 : index
    %c0_4 = arith.constant 0 : index
    %2 = vector.load %arg0[%c0_3, %c0_4] : memref<64x16xbf16, #tpu.memory_space<vmem>>, vector<64x16xbf16>
    %c0_5 = arith.constant 0 : index
    %c0_6 = arith.constant 0 : index
    %3 = vector.load %arg1[%c0_5, %c0_6] : memref<16x32xbf16, #tpu.memory_space<vmem>>, vector<16x32xbf16>
    %cst = arith.constant dense<0.000000e+00> : vector<64x32xf32>
    %4 = tpu.matmul %2, %3, %cst {dimension_numbers = #tpu.dot_dimension_numbers<[1], [0], [0], [1], [0, 0, 1, 1], [], []>} : vector<64x16xbf16>, vector<16x32xbf16>, vector<64x32xf32> -> vector<64x32xf32>
    %5 = vector.broadcast %1 : vector<1x32xf32> to vector<64x32xf32>
    %6 = arith.addf %4, %5 : vector<64x32xf32>
    %7 = vector.extract_strided_slice %6 {offsets = [0, 0], sizes = [8, 32], strides = [1, 1]} : vector<64x32xf32> to vector<8x32xf32>
    %8 = math.tanh %7 : vector<8x32xf32>
    %9 = vector.extract_strided_slice %6 {offsets = [8, 0], sizes = [8, 32], strides = [1, 1]} : vector<64x32xf32> to vector<8x32xf32>
    %10 = arith.truncf %8 : vector<8x32xf32> to vector<8x32xbf16>
    %cst_7 = arith.constant dense<0.000000e+00> : vector<8x32xf32>
    %11 = tpu.matmul %10, %0, %cst_7 {dimension_numbers = #tpu.dot_dimension_numbers<[1], [0], [0], [1], [0, 0, 1, 1], [], []>} : vector<8x32xbf16>, vector<32x32xbf16>, vector<8x32xf32> -> vector<8x32xf32>
    %12 = arith.addf %9, %11 : vector<8x32xf32>
    %13 = math.tanh %12 : vector<8x32xf32>
    %14 = vector.extract_strided_slice %6 {offsets = [16, 0], sizes = [8, 32], strides = [1, 1]} : vector<64x32xf32> to vector<8x32xf32>
    %15 = arith.truncf %13 : vector<8x32xf32> to vector<8x32xbf16>
    %cst_8 = arith.constant dense<0.000000e+00> : vector<8x32xf32>
    %16 = tpu.matmul %15, %0, %cst_8 {dimension_numbers = #tpu.dot_dimension_numbers<[1], [0], [0], [1], [0, 0, 1, 1], [], []>} : vector<8x32xbf16>, vector<32x32xbf16>, vector<8x32xf32> -> vector<8x32xf32>
    %17 = arith.addf %14, %16 : vector<8x32xf32>
    %18 = math.tanh %17 : vector<8x32xf32>
    %19 = vector.extract_strided_slice %6 {offsets = [24, 0], sizes = [8, 32], strides = [1, 1]} : vector<64x32xf32> to vector<8x32xf32>
    %20 = arith.truncf %18 : vector<8x32xf32> to vector<8x32xbf16>
    %cst_9 = arith.constant dense<0.000000e+00> : vector<8x32xf32>
    %21 = tpu.matmul %20, %0, %cst_9 {dimension_numbers = #tpu.dot_dimension_numbers<[1], [0], [0], [1], [0, 0, 1, 1], [], []>} : vector<8x32xbf16>, vector<32x32xbf16>, vector<8x32xf32> -> vector<8x32xf32>
    %22 = arith.addf %19, %21 : vector<8x32xf32>
    %23 = math.tanh %22 : vector<8x32xf32>
    %24 = vector.extract_strided_slice %6 {offsets = [32, 0], sizes = [8, 32], strides = [1, 1]} : vector<64x32xf32> to vector<8x32xf32>
    %25 = arith.truncf %23 : vector<8x32xf32> to vector<8x32xbf16>
    %cst_10 = arith.constant dense<0.000000e+00> : vector<8x32xf32>
    %26 = tpu.matmul %25, %0, %cst_10 {dimension_numbers = #tpu.dot_dimension_numbers<[1], [0], [0], [1], [0, 0, 1, 1], [], []>} : vector<8x32xbf16>, vector<32x32xbf16>, vector<8x32xf32> -> vector<8x32xf32>
    %27 = arith.addf %24, %26 : vector<8x32xf32>
    %28 = math.tanh %27 : vector<8x32xf32>
    %29 = vector.extract_strided_slice %6 {offsets = [40, 0], sizes = [8, 32], strides = [1, 1]} : vector<64x32xf32> to vector<8x32xf32>
    %30 = arith.truncf %28 : vector<8x32xf32> to vector<8x32xbf16>
    %cst_11 = arith.constant dense<0.000000e+00> : vector<8x32xf32>
    %31 = tpu.matmul %30, %0, %cst_11 {dimension_numbers = #tpu.dot_dimension_numbers<[1], [0], [0], [1], [0, 0, 1, 1], [], []>} : vector<8x32xbf16>, vector<32x32xbf16>, vector<8x32xf32> -> vector<8x32xf32>
    %32 = arith.addf %29, %31 : vector<8x32xf32>
    %33 = math.tanh %32 : vector<8x32xf32>
    %34 = vector.extract_strided_slice %6 {offsets = [48, 0], sizes = [8, 32], strides = [1, 1]} : vector<64x32xf32> to vector<8x32xf32>
    %35 = arith.truncf %33 : vector<8x32xf32> to vector<8x32xbf16>
    %cst_12 = arith.constant dense<0.000000e+00> : vector<8x32xf32>
    %36 = tpu.matmul %35, %0, %cst_12 {dimension_numbers = #tpu.dot_dimension_numbers<[1], [0], [0], [1], [0, 0, 1, 1], [], []>} : vector<8x32xbf16>, vector<32x32xbf16>, vector<8x32xf32> -> vector<8x32xf32>
    %37 = arith.addf %34, %36 : vector<8x32xf32>
    %38 = math.tanh %37 : vector<8x32xf32>
    %39 = vector.extract_strided_slice %6 {offsets = [56, 0], sizes = [8, 32], strides = [1, 1]} : vector<64x32xf32> to vector<8x32xf32>
    %40 = arith.truncf %38 : vector<8x32xf32> to vector<8x32xbf16>
    %cst_13 = arith.constant dense<0.000000e+00> : vector<8x32xf32>
    %41 = tpu.matmul %40, %0, %cst_13 {dimension_numbers = #tpu.dot_dimension_numbers<[1], [0], [0], [1], [0, 0, 1, 1], [], []>} : vector<8x32xbf16>, vector<32x32xbf16>, vector<8x32xf32> -> vector<8x32xf32>
    %42 = arith.addf %39, %41 : vector<8x32xf32>
    %43 = math.tanh %42 : vector<8x32xf32>
    %44 = arith.truncf %43 : vector<8x32xf32> to vector<8x32xbf16>
    %c0_14 = arith.constant 0 : index
    %c0_15 = arith.constant 0 : index
    %45 = vector.load %arg4[%c0_14, %c0_15] : memref<32x4xbf16, #tpu.memory_space<vmem>>, vector<32x4xbf16>
    %cst_16 = arith.constant dense<0.000000e+00> : vector<8x4xf32>
    %46 = tpu.matmul %44, %45, %cst_16 {dimension_numbers = #tpu.dot_dimension_numbers<[1], [0], [0], [1], [0, 0, 1, 1], [], []>} : vector<8x32xbf16>, vector<32x4xbf16>, vector<8x4xf32> -> vector<8x4xf32>
    %c0_17 = arith.constant 0 : index
    %c0_18 = arith.constant 0 : index
    %47 = vector.load %arg5[%c0_17, %c0_18] : memref<1x4xf32, #tpu.memory_space<vmem>>, vector<1x4xf32>
    %48 = vector.broadcast %47 : vector<1x4xf32> to vector<8x4xf32>
    %49 = arith.addf %46, %48 : vector<8x4xf32>
    %50 = arith.negf %49 : vector<8x4xf32>
    %51 = math.exp %50 : vector<8x4xf32>
    %cst_19 = arith.constant 1.000000e+00 : f32
    %52 = vector.broadcast %cst_19 : f32 to vector<8x4xf32>
    %53 = arith.addf %52, %51 : vector<8x4xf32>
    %54 = arith.divf %52, %53 : vector<8x4xf32>
    %c0_20 = arith.constant 0 : index
    %c0_21 = arith.constant 0 : index
    %55 = vector.load %arg6[%c0_20, %c0_21] : memref<8x4xf32, #tpu.memory_space<vmem>>, vector<8x4xf32>
    tpu.vector_store %arg6[%c0_20, %c0_21], %54 {strides = array<i32>} : memref<8x4xf32, #tpu.memory_space<vmem>>, vector<8x4xf32>,
    return
  }
}

</mosaic_0001>

<bundles_post_ra>
// kernel: tpu_custom_call.1
= control target key start
LH: loop header
LB: loop body
LE: loop exit
PB: predicated region body
PF: predicated region fallthrough
CT: control target
= control target key end

     0   :  { %vm71_vm0 = vcmask 130048   ;;  %v722_v4 = vmov 0.0   ;;  %vm723_vm1 = vmmov 0   ;;  %vm163_vm2 = vcmask 261120   ;;  %s867_s1 = inlined_call_operand.vmem [shape: bf16[16,32], index: 1, kind: input, shape index: {}]   ;;  %s868_s0 = inlined_call_operand.vmem [shape: bf16[64,16], index: 0, kind: input, shape index: {}]   ;;  %s869_s2 = inlined_call_operand.vmem [shape: bf16[32,32], index: 2, kind: input, shape index: {}]   ;;  %s870_s3 = inlined_call_operand.vmem [shape: f32[1,32], index: 3, kind: input, shape index: {}]   ;;  %s871_s4 = inlined_call_operand.vmem [shape: bf16[32,4], index: 4, kind: input, shape index: {}]   ;;  %s872_s5 = inlined_call_operand.vmem [shape: f32[1,4], index: 5, kind: input, shape index: {}]   ;;  %s873_s6 = inlined_call_operand.vmem [shape: f32[8,4], index: 6, kind: output, shape index: {}]  }
   0x1   :  { %v693_v0 = vld [vmem:[%s867_s1] sm:$0xff]   ;;  %v695_v2 = vld [vmem:[%s868_s0 + $0x8] sm:$0xff]   ;;  %627 = vmatprep.subr.bf16.mxu1 %v722_v4  ;;  %631 = vmatprep.mubr.msk.bf16.mxu1 %vm723_vm1, %v722_v4  ;;  %v698_v22 = vld [vmem:[%s868_s0 + $0x10] sm:$0xff]   ;;  %vm558_vm3 = vcmask 31744  }
   0x2   :  { %v694_v1 = vld [vmem:[%s868_s0] sm:$0xff]   ;;  %617 = vmatprep.subr.bf16.mxu0 %v693_v0  ;;  %v773_v3 = vld [vmem:[%s869_s2 + $0x8] sm:$0xff]   ;;  %v699_v23 = vld [vmem:[%s868_s0 + $0x18] sm:$0xff]  }
   0x3   :  { %618 = vmatpush3.bf16.msra.mxu0 %v693_v0  ;;  %619 = vmatprep.mubr.msk.bf16.mxu0 %vm71_vm0, %v694_v1  ;;  %v784_v5 = vld [vmem:[%s869_s2] sm:$0xff]  }
   0x4   :  { %643 = vmatprep.subr.bf16.mxu0 %v722_v4  ;;  %628 = vmatpush3.bf16.msra.mxu1 %v773_v3  ;;  %v795_v7 = vld [vmem:[%s870_s3] ss:$0 sm:$0xff] }
   0x5   :  { %629 = vmatprep.subr.bf16.mxu1 %v722_v4 }
   0x6   :  { %620 = vmatmul.mubr.msk.bf16.vlgmr.msra.gmra.mxu0 %vm71_vm0, %v695_v2 }
   0x7   :  { %644 = vmatpush3.bf16.msra.mxu0 %v773_v3  ;;  %623 = vmatprep.mubr.msk.bf16.mxu0 %vm71_vm0, %v698_v22 }
   0x8   :  { %645 = vmatprep.subr.bf16.mxu0 %v722_v4  ;;  %630 = vmatpush3.bf16.msra.mxu1 %v784_v5 }
   0x9   :  { %635 = vmatprep.subr.bf16.mxu1 %v722_v4 }
   0xb   :  { %646 = vmatpush3.bf16.msra.mxu0 %v784_v5 }
   0xc   :  { %659 = vmatprep.subr.bf16.mxu0 %v722_v4 }
   0xe   :  { %624 = vmatmul.mubr.msk.bf16.gmra.mxu0 %vm71_vm0, %v699_v23 }
   0xf   :  { %647 = vmatprep.mubr.msk.bf16.mxu0 %vm723_vm1, %v722_v4 }
  0xc6   :  { %v621_v6 = vpop.f32.mrf.mxu0 }
  0xc7   :  { %v127_v24 = vadd.f32 %v621_v6, %v795_v7  ;;  %v701_v6 = vld [vmem:[%s871_s4] sm:$0xff]  }
  0xc8   :  { %v118_v8 = vpop.f32.mrf.mxu0 }
  0xc9   :  { %v119_v9 = vadd.f32 %v795_v7, %v118_v8 }
  0xca   :  { %v622_v12 = vpop.f32.mrf.mxu0 }
  0xcb   :  { %702 = vtanh.f32 %v119_v9  ;;  %v130_v36 = vadd.f32 %v622_v12, %v795_v7 }
  0xcc   :  { %v121_v13 = vpop.f32.mrf.mxu0 }
  0xcd   :  { %v122_v14 = vadd.f32 %v795_v7, %v121_v13 }
  0xce   :  { %v625_v32 = vpop.f32.mrf.mxu0 }
  0xcf   :  { %v143_v60 = vadd.f32 %v625_v32, %v795_v7 }
  0xd0   :  { %v134_v33 = vpop.f32.mrf.mxu0 }
  0xd1   :  { %v135_v44 = vadd.f32 %v795_v7, %v134_v33 }
  0xd2   :  { %v626_v34 = vpop.f32.mrf.mxu0 }
  0xd3   :  { %v146_v8 = vadd.f32 %v626_v34, %v795_v7 }
  0xd4   :  { %v137_v35 = vpop.f32.mrf.mxu0 }
  0xd5   :  { %v138_v52 = vadd.f32 %v795_v7, %v137_v35 }
  0xd8   :  { %v703_v10 = vpop.eup %702 }
  0xd9   :  { %v150_v11 = vpack.c.bf16 %v703_v10, %v703_v10 }
  0xdb   :  { %632 = vmatmul.mubr.msk.bf16.vlgmr.msra.gmra.mxu1 %vm163_vm2, %v150_v11 }
  0xdc   :  { %636 = vmatpush3.bf16.msra.mxu1 %v773_v3  ;;  %639 = vmatprep.mubr.msk.bf16.mxu1 %vm723_vm1, %v722_v4 }
  0xdd   :  { %637 = vmatprep.subr.bf16.mxu1 %v722_v4 }
  0xe0   :  { %638 = vmatpush3.bf16.msra.mxu1 %v784_v5 }
  0xe1   :  { %651 = vmatprep.subr.bf16.mxu1 %v722_v4 }
 0x19b   :  { %v201_v15 = vpop.f32.mrf.mxu1 }
 0x19c   :  { %v207_v16 = vadd.f32 %v201_v15, %v122_v14 }
 0x19d   :  { %v633_v17 = vpop.f32.mrf.mxu1 }
 0x19e   :  { %704 = vtanh.f32 %v207_v16 }
 0x19f   :  { %v204_v18 = vpop.f32.mrf.mxu1 }
 0x1a1   :  { %v634_v19 = vpop.f32.mrf.mxu1 }
 0x1ab   :  { %v705_v20 = vpop.eup %704 }
 0x1ac   :  { %v209_v21 = vpack.c.bf16 %v705_v20, %v705_v20 }
 0x1ae   :  { %640 = vmatmul.mubr.msk.bf16.vlgmr.msra.gmra.mxu1 %vm163_vm2, %v209_v21 }
 0x1af   :  { %652 = vmatpush3.bf16.msra.mxu1 %v773_v3  ;;  %655 = vmatprep.mubr.msk.bf16.mxu1 %vm723_vm1, %v722_v4 }
 0x1b0   :  { %653 = vmatprep.subr.bf16.mxu1 %v722_v4 }
 0x1b3   :  { %654 = vmatpush3.bf16.msra.mxu1 %v784_v5 }
 0x1b4   :  { %667 = vmatprep.subr.bf16.mxu1 %v722_v4 }
 0x26e   :  { %v247_v25 = vpop.f32.mrf.mxu1 }
 0x26f   :  { %v253_v26 = vadd.f32 %v247_v25, %v127_v24 }
 0x270   :  { %v641_v27 = vpop.f32.mrf.mxu1 }
 0x271   :  { %706 = vtanh.f32 %v253_v26 }
 0x272   :  { %v250_v28 = vpop.f32.mrf.mxu1 }
 0x274   :  { %v642_v29 = vpop.f32.mrf.mxu1 }
 0x27e   :  { %v707_v30 = vpop.eup %706 }
 0x27f   :  { %v255_v31 = vpack.c.bf16 %v707_v30, %v707_v30 }
 0x281   :  { %648 = vmatmul.mubr.msk.bf16.vlgmr.msra.gmra.mxu0 %vm163_vm2, %v255_v31 }
 0x282   :  { %660 = vmatpush3.bf16.msra.mxu0 %v773_v3  ;;  %663 = vmatprep.mubr.msk.bf16.mxu0 %vm723_vm1, %v722_v4 }
 0x283   :  { %661 = vmatprep.subr.bf16.mxu0 %v722_v4 }
 0x286   :  { %662 = vmatpush3.bf16.msra.mxu0 %v784_v5 }
 0x287   :  { %675 = vmatprep.subr.bf16.mxu0 %v722_v4 }
 0x341   :  { %v293_v37 = vpop.f32.mrf.mxu0 }
 0x342   :  { %v299_v38 = vadd.f32 %v293_v37, %v130_v36 }
 0x343   :  { %v649_v39 = vpop.f32.mrf.mxu0 }
 0x344   :  { %708 = vtanh.f32 %v299_v38 }
 0x345   :  { %v296_v40 = vpop.f32.mrf.mxu0 }
 0x347   :  { %v650_v41 = vpop.f32.mrf.mxu0 }
 0x351   :  { %v709_v42 = vpop.eup %708 }
 0x352   :  { %v301_v43 = vpack.c.bf16 %v709_v42, %v709_v42 }
 0x354   :  { %656 = vmatmul.mubr.msk.bf16.vlgmr.msra.gmra.mxu1 %vm163_vm2, %v301_v43 }
 0x355   :  { %668 = vmatpush3.bf16.msra.mxu1 %v773_v3  ;;  %671 = vmatprep.mubr.msk.bf16.mxu1 %vm723_vm1, %v722_v4 }
 0x356   :  { %669 = vmatprep.subr.bf16.mxu1 %v722_v4 }
 0x359   :  { %670 = vmatpush3.bf16.msra.mxu1 %v784_v5 }
 0x35a   :  { %683 = vmatprep.subr.bf16.mxu1 %v722_v4 }
 0x414   :  { %v339_v45 = vpop.f32.mrf.mxu1 }
 0x415   :  { %v345_v46 = vadd.f32 %v339_v45, %v135_v44 }
 0x416   :  { %v657_v47 = vpop.f32.mrf.mxu1 }
 0x417   :  { %710 = vtanh.f32 %v345_v46 }
 0x418   :  { %v342_v48 = vpop.f32.mrf.mxu1 }
 0x41a   :  { %v658_v49 = vpop.f32.mrf.mxu1 }
 0x424   :  { %v711_v50 = vpop.eup %710 }
 0x425   :  { %v347_v51 = vpack.c.bf16 %v711_v50, %v711_v50 }
 0x427   :  { %664 = vmatmul.mubr.msk.bf16.vlgmr.msra.gmra.mxu0 %vm163_vm2, %v347_v51 }
 0x428   :  { %676 = vmatpush3.bf16.msra.mxu0 %v773_v3  ;;  %679 = vmatprep.mubr.msk.bf16.mxu0 %vm723_vm1, %v722_v4 }
 0x429   :  { %677 = vmatprep.subr.bf16.mxu0 %v722_v4 }
 0x42c   :  { %678 = vmatpush3.bf16.msra.mxu0 %v784_v5  ;;  %v700_v5 = vld [vmem:[%s871_s4 + $0x8] sm:$0xff]  }
 0x4e7   :  { %v385_v53 = vpop.f32.mrf.mxu0 }
 0x4e8   :  { %v391_v54 = vadd.f32 %v385_v53, %v138_v52 }
 0x4e9   :  { %v665_v55 = vpop.f32.mrf.mxu0 }
 0x4ea   :  { %712 = vtanh.f32 %v391_v54 }
 0x4eb   :  { %v388_v56 = vpop.f32.mrf.mxu0 }
 0x4ed   :  { %v666_v57 = vpop.f32.mrf.mxu0 }
 0x4f7   :  { %v713_v58 = vpop.eup %712 }
 0x4f8   :  { %v393_v59 = vpack.c.bf16 %v713_v58, %v713_v58 }
 0x4fa   :  { %672 = vmatmul.mubr.msk.bf16.vlgmr.msra.gmra.mxu1 %vm163_vm2, %v393_v59 }
 0x4fb   :  { %687 = vmatprep.mubr.msk.bf16.mxu1 %vm723_vm1, %v722_v4  ;;  %684 = vmatpush3.bf16.msra.mxu1 %v700_v5 }
 0x4fc   :  { %685 = vmatprep.subr.bf16.mxu1 %v722_v4  ;;  %v583_v4 = vld [vmem:[%s872_s5] ss:$0 sm:$0xff] }
 0x4ff   :  { %686 = vmatpush3.bf16.msra.mxu1 %v701_v6 }
 0x5ba   :  { %v431_v61 = vpop.f32.mrf.mxu1 }
 0x5bb   :  { %v437_v62 = vadd.f32 %v431_v61, %v143_v60 }
 0x5bc   :  { %v673_v63 = vpop.f32.mrf.mxu1 }
 0x5bd   :  { %714 = vtanh.f32 %v437_v62 }
 0x5be   :  { %v434_v0 = vpop.f32.mrf.mxu1 }
 0x5c0   :  { %v674_v1 = vpop.f32.mrf.mxu1 }
 0x5ca   :  { %v715_v2 = vpop.eup %714 }
 0x5cb   :  { %v439_v3 = vpack.c.bf16 %v715_v2, %v715_v2 }
 0x5cd   :  { %680 = vmatmul.mubr.msk.bf16.vlgmr.msra.gmra.mxu0 %vm163_vm2, %v439_v3 }
 0x68d   :  { %v477_v9 = vpop.f32.mrf.mxu0 }
 0x68e   :  { %v483_v10 = vadd.f32 %v477_v9, %v146_v8 }
 0x68f   :  { %v681_v11 = vpop.f32.mrf.mxu0 }
 0x690   :  { %716 = vtanh.f32 %v483_v10 }
 0x691   :  { %v480_v12 = vpop.f32.mrf.mxu0 }
 0x693   :  { %v682_v13 = vpop.f32.mrf.mxu0 }
 0x69d   :  { %v717_v14 = vpop.eup %716 }
 0x69e   :  { %v485_v15 = vpack.c.bf16 %v717_v14, %v717_v14 }
 0x6a0   :  { %688 = vmatmul.mubr.msk.bf16.vlgmr.msra.gmra.mxu1 %vm163_vm2, %v485_v15 }
 0x760   :  { %v546_v16 = vpop.f32.mrf.mxu1 }
 0x761   :  { %v547_v17 = vadd.f32 %v583_v4, %v546_v16 }
 0x762   :  { %v689_v18 = vpop.f32.mrf.mxu1 }
 0x763   :  { %v587_v19 = vmul.f32 -1.442695, %v547_v17 }
 0x764   :  { %v549_v20 = vpop.f32.mrf.mxu1 }
 0x765   :  { %718 = vpow2.f32 %v587_v19 }
 0x766   :  { %v690_v7 = vpop.f32.mrf.mxu1 }
 0x772   :  { %v719_v21 = vpop.eup %718 }
 0x773   :  { %v555_v22 = vadd.f32 1.0, %v719_v21 }
 0x775   :  { %720 = vrcp.f32 %v555_v22 }
 0x782   :  { %v721_v23 = vpop.eup %720 }
 0x783   :  { %559 = vst.msk [vmem:[%s873_s6] sm:$0xff] %vm558_vm3, %v721_v23 }

</bundles_post_ra>
